<compile_context>
chip_gen: v7x
topology: tpu7x:2x2x1
jax: 0.10.0
libtpu: 0.0.40
codegen_flags: <defaults>
</compile_context>

<pallas_src>
import jax
import jax.numpy as jnp
from jax.experimental import pallas as pl
from jax.experimental.pallas import tpu as pltpu


def _write_head_kernel(w_ref, e_ref, a_ref, mem_ref, out_ref):
    # w_ref:   (TB, N, 1)   broadcasts along lanes (M)
    # e_ref:   (TB, 1, M)   broadcasts along sublanes (N)
    # a_ref:   (TB, 1, M)
    # mem_ref: (TB, N, M)
    w = w_ref[...]
    e = e_ref[...]
    a = a_ref[...]
    mem = mem_ref[...]
    # mem * (1 - w*e) + w*a  ==  mem + w * (a - mem * e)   (4 VPU ops/element)
    out = mem + w * (a - mem * e)
    out_ref[...] = out.astype(out_ref.dtype)


def _round_up(x, m):
    return -(-x // m) * m


def _vmem_capacity_bytes():
    try:
        info = pltpu.get_tpu_info()
        cap = int(getattr(info, "vmem_capacity_bytes", 0) or 0)
        if cap > 0:
            return cap
    except Exception:
        pass
    return 64 * 1024 * 1024  # conservative fallback: v7x per-TensorCore VMEM


def _choose_batch_block(B, N, M, mem_isz, w_isz, ea_isz, vmem_budget_bytes):
    """Pick the batch block TB from a padding-aware VMEM model.

    Mosaic pads the last two dims of every VMEM block to (8 sublanes, 128
    lanes), so per batch element the double-buffered operands cost:
      memory in + out : ceil(N/8)*8 * ceil(M/128)*128 * isz   (4 buffers)
      w  (TB, N, 1)   : ceil(N/8)*8 * 128            * isz    (2 buffers)
      e,a (TB, 1, M)  : 8 * ceil(M/128)*128          * isz    (2 buffers each)
    """
    mem_tile = _round_up(N, 8) * _round_up(M, 128) * mem_isz
    w_tile = _round_up(N, 8) * 128 * w_isz
    ea_tile = 8 * _round_up(M, 128) * ea_isz
    per_elem = 2 * (2 * mem_tile + w_tile + 2 * ea_tile)

    tb = max(1, vmem_budget_bytes // per_elem)
    tb = min(tb, B)

    if tb >= B:
        # Whole problem fits in a single tile.
        if B >= 2 and B * mem_tile >= 8 * 1024 * 1024:
            # Large enough that ~0.35 us/step is noise: >=4 steps lets a v7x
            # megacore shard the batch axis and keeps writeback overlapped
            # with the next input DMA; near-free on single-TC v5e/v6e.
            tb = pl.cdiv(B, min(B, 4))
        else:
            tb = B  # tiny-problem guard: one grid step, no per-step overhead
    return tb


def ntm_write_head_forward(w, memory, params):
    """Pallas implementation of NTMWriteHead.forward.

    Args:
      w:      (B, N) float array
      memory: (B, N, M) float array
      params: dict with 'e' and 'a', each (B, M)
    Returns:
      new memory: (B, N, M) float array
    """
    e = params["e"]
    a = params["a"]

    B, N = w.shape
    Bm, Nm, M = memory.shape
    assert B == Bm and N == Nm
    assert e.shape == (B, M) and a.shape == (B, M)

    mem_isz = jnp.dtype(memory.dtype).itemsize
    w_isz = jnp.dtype(w.dtype).itemsize
    ea_isz = max(jnp.dtype(e.dtype).itemsize, jnp.dtype(a.dtype).itemsize)

    vmem_cap = _vmem_capacity_bytes()
    vmem_budget = int(vmem_cap * 0.60)                       # all live buffers
    vmem_limit = min(112 * 1024 * 1024,
                     max(32 * 1024 * 1024, int(vmem_cap * 0.75)))

    TB = _choose_batch_block(B, N, M, mem_isz, w_isz, ea_isz, vmem_budget)
    grid = (pl.cdiv(B, TB),)

    # Broadcast-ready shapes (free row-major reshapes) so the kernel never has
    # to expand_dims / relayout in VMEM.
    w3 = w.reshape(B, N, 1)
    e3 = e.reshape(B, 1, M)
    a3 = a.reshape(B, 1, M)

    cost = pl.CostEstimate(
        flops=4 * B * N * M,
        transcendentals=0,
        bytes_accessed=(2 * B * N * M * mem_isz        # memory in + out
                        + B * N * w_isz
                        + 2 * B * M * ea_isz),
    )

    return pl.pallas_call(
        _write_head_kernel,
        out_shape=jax.ShapeDtypeStruct((B, N, M), memory.dtype),
        grid_spec=pltpu.PrefetchScalarGridSpec(
            num_scalar_prefetch=0,
            grid=grid,
            in_specs=[
                pl.BlockSpec((TB, N, 1), lambda b: (b, 0, 0)),
                pl.BlockSpec((TB, 1, M), lambda b: (b, 0, 0)),
                pl.BlockSpec((TB, 1, M), lambda b: (b, 0, 0)),
                pl.BlockSpec((TB, N, M), lambda b: (b, 0, 0)),
            ],
            out_specs=pl.BlockSpec((TB, N, M), lambda b: (b, 0, 0)),
        ),
        compiler_params=pltpu.CompilerParams(
            dimension_semantics=("parallel",),
            vmem_limit_bytes=vmem_limit,
        ),
        cost_estimate=cost,
    )(w3, e3, a3, memory)


if __name__ == "__main__":
    key = jax.random.PRNGKey(0)
    k_w, k_mem, k_e, k_a = jax.random.split(key, 4)

    B = 2    # batch
    N = 8    # number of memory locations
    M = 32   # memory feature size

    # Addressing weights (softmax over locations, as an NTM head would emit).
    w = jax.nn.softmax(jax.random.normal(k_w, (B, N), jnp.float32), axis=-1)
    memory = jax.random.normal(k_mem, (B, N, M), jnp.float32)
    # Erase vector in [0, 1] (sigmoid-activated in a real NTM), add vector free.
    e = jax.nn.sigmoid(jax.random.normal(k_e, (B, M), jnp.float32))
    a = jax.random.normal(k_a, (B, M), jnp.float32)
    params = {"e": e, "a": a}

    new_mem = ntm_write_head_forward(w, memory, params)
    new_mem = jax.block_until_ready(new_mem)

    # Reference: same math as the torch.ger loop, vectorized.
    we = w[:, :, None] * e[:, None, :]
    wa = w[:, :, None] * a[:, None, :]
    ref = memory * (1.0 - we) + wa

    assert new_mem.shape == (B, N, M)
    assert jnp.allclose(new_mem, ref, atol=1e-5, rtol=1e-5)

    print("KERNEL_OK")
</pallas_src>

<mosaic_0001>
module attributes {stable_mosaic.version = 11 : i64} {
  func.func @_write_head_kernel(%arg0: i32, %arg1: memref<2x8x1xf32, #tpu.memory_space<vmem>>, %arg2: memref<2x1x32xf32, #tpu.memory_space<vmem>>, %arg3: memref<2x1x32xf32, #tpu.memory_space<vmem>>, %arg4: memref<2x8x32xf32, #tpu.memory_space<vmem>>, %arg5: memref<2x8x32xf32, #tpu.memory_space<vmem>>) attributes {dimension_semantics = [#tpu.dimension_semantics<parallel>], iteration_bounds = array<i64: 1>, scalar_prefetch = 0 : i64, scratch_operands = 0 : i64, tpu.core_type = #tpu.core_type<tc>, window_params = [{transform_indices = @transform_0, window_bounds = array<i64: 2, 8, 1>}, {transform_indices = @transform_1, window_bounds = array<i64: 2, 1, 32>}, {transform_indices = @transform_2, window_bounds = array<i64: 2, 1, 32>}, {transform_indices = @transform_3, window_bounds = array<i64: 2, 8, 32>}, {transform_indices = @transform_4, window_bounds = array<i64: 2, 8, 32>}]} {
    %c0 = arith.constant 0 : index
    %c0_0 = arith.constant 0 : index
    %c0_1 = arith.constant 0 : index
    %0 = vector.load %arg1[%c0, %c0_0, %c0_1] : memref<2x8x1xf32, #tpu.memory_space<vmem>>, vector<2x8x1xf32>
    %c0_2 = arith.constant 0 : index
    %c0_3 = arith.constant 0 : index
    %c0_4 = arith.constant 0 : index
    %1 = vector.load %arg2[%c0_2, %c0_3, %c0_4] : memref<2x1x32xf32, #tpu.memory_space<vmem>>, vector<2x1x32xf32>
    %c0_5 = arith.constant 0 : index
    %c0_6 = arith.constant 0 : index
    %c0_7 = arith.constant 0 : index
    %2 = vector.load %arg3[%c0_5, %c0_6, %c0_7] : memref<2x1x32xf32, #tpu.memory_space<vmem>>, vector<2x1x32xf32>
    %c0_8 = arith.constant 0 : index
    %c0_9 = arith.constant 0 : index
    %c0_10 = arith.constant 0 : index
    %3 = vector.load %arg4[%c0_8, %c0_9, %c0_10] : memref<2x8x32xf32, #tpu.memory_space<vmem>>, vector<2x8x32xf32>
    %4 = vector.broadcast %1 : vector<2x1x32xf32> to vector<2x8x32xf32>
    %5 = arith.mulf %3, %4 : vector<2x8x32xf32>
    %6 = vector.broadcast %2 : vector<2x1x32xf32> to vector<2x8x32xf32>
    %7 = arith.subf %6, %5 : vector<2x8x32xf32>
    %8 = vector.broadcast %0 : vector<2x8x1xf32> to vector<2x8x32xf32>
    %9 = arith.mulf %8, %7 : vector<2x8x32xf32>
    %10 = arith.addf %3, %9 : vector<2x8x32xf32>
    %c0_11 = arith.constant 0 : index
    %c0_12 = arith.constant 0 : index
    %c0_13 = arith.constant 0 : index
    %11 = vector.load %arg5[%c0_11, %c0_12, %c0_13] : memref<2x8x32xf32, #tpu.memory_space<vmem>>, vector<2x8x32xf32>
    tpu.vector_store %arg5[%c0_11, %c0_12, %c0_13], %10 {strides = array<i32>} : memref<2x8x32xf32, #tpu.memory_space<vmem>>, vector<2x8x32xf32>,
    return
  }
  func.func @transform_0(%arg0: i32) -> (i32, i32, i32) {
    %c0_i32 = arith.constant 0 : i32
    %c0_i32_0 = arith.constant 0 : i32
    %c0_i32_1 = arith.constant 0 : i32
    return %arg0, %c0_i32, %c0_i32_0 : i32, i32, i32
  }
  func.func @transform_1(%arg0: i32) -> (i32, i32, i32) {
    %c0_i32 = arith.constant 0 : i32
    %c0_i32_0 = arith.constant 0 : i32
    %c0_i32_1 = arith.constant 0 : i32
    return %arg0, %c0_i32, %c0_i32_0 : i32, i32, i32
  }
  func.func @transform_2(%arg0: i32) -> (i32, i32, i32) {
    %c0_i32 = arith.constant 0 : i32
    %c0_i32_0 = arith.constant 0 : i32
    %c0_i32_1 = arith.constant 0 : i32
    return %arg0, %c0_i32, %c0_i32_0 : i32, i32, i32
  }
  func.func @transform_3(%arg0: i32) -> (i32, i32, i32) {
    %c0_i32 = arith.constant 0 : i32
    %c0_i32_0 = arith.constant 0 : i32
    %c0_i32_1 = arith.constant 0 : i32
    return %arg0, %c0_i32, %c0_i32_0 : i32, i32, i32
  }
  func.func @transform_4(%arg0: i32) -> (i32, i32, i32) {
    %c0_i32 = arith.constant 0 : i32
    %c0_i32_0 = arith.constant 0 : i32
    %c0_i32_1 = arith.constant 0 : i32
    return %arg0, %c0_i32, %c0_i32_0 : i32, i32, i32
  }
}

</mosaic_0001>

<bundles_post_ra>
// kernel: tpu_custom_call.1
= control target key start
LH: loop header
LB: loop body
LE: loop exit
PB: predicated region body
PF: predicated region fallthrough
CT: control target
= control target key end

     0   :  { %v120_v1 = vmov 0   ;;  %s185_s0 = inlined_call_operand.vmem [shape: f32[2,8,1], index: 0, kind: input, shape index: {}]   ;;  %s186_s1 = inlined_call_operand.vmem [shape: f32[2,1,32], index: 1, kind: input, shape index: {}]   ;;  %s187_s2 = inlined_call_operand.vmem [shape: f32[2,1,32], index: 2, kind: input, shape index: {}]   ;;  %s188_s3 = inlined_call_operand.vmem [shape: f32[2,8,32], index: 3, kind: input, shape index: {}]   ;;  %s189_s4 = inlined_call_operand.hbm [shape: f32[2,8,32], index: 4, kind: output, shape index: {}]  }
   0x1   :  { %v18_v0 = vld [vmem:[%s185_s0] sm:$0xff]  ;;  %95 = vset.pattern.permute.xlu0 %v120_v1 }
   0x2   :  { %56 = vperm.xlu0 %95, %v18_v0  }
   0x3   :  { %9 = vsyncpa [#allocation3], 0  ;;  %v19_v2 = vld [vmem:[%s185_s0 + $0x8] sm:$0xff]  ;;  %v87_v3 = vld [vmem:[%s186_s1] ss:$0 sm:$0xff]  ;;  %vm68_vm0 = vcmask 261120  }
   0x4   :  { %v24_v4 = vld [vmem:[%s188_s3] sm:$0xff]  ;;  %v25_v8 = vld [vmem:[%s188_s3 + $0x8] sm:$0xff]  ;;  %s121_s30 = smov [#allocation2]  }
   0x5   :  { %v38_v5 = vmul.f32 %v87_v3, %v24_v4  ;;  %v89_v6 = vld [vmem:[%s187_s2] ss:$0 sm:$0xff]  ;;  %v88_v7 = vld [vmem:[%s186_s1 + $0x1] ss:$0 sm:$0xff]  ;;  %s76_s5 = sshll.u32 %s121_s30, 4  ;;  %s77_s5 = int_to_ptr.vmem [resolvable:$true] %s76_s5 }
   0x6   :  { %61 = vperm.xlu0 %95, %v19_v2   ;;  %v39_v10 = vmul.f32 %v88_v7, %v25_v8  ;;  %v90_v11 = vld [vmem:[%s187_s2 + $0x1] ss:$0 sm:$0xff]  ;;  %s96_s1 = scalar_lea.vmem %s77_s5, 256  ;;  %p101_p1 = scmp.lt.s32.totalorder %s77_s5, %s77_s5 }
   0x7   :  { %v52_v9 = vsub.f32 %v89_v6, %v38_v5  ;;  %p97_p0 = scmp.ne.s32.totalorder %s77_s5, %s96_s1  ;;  %p102_p2 = scmp.lt.s32.totalorder %s96_s1, %s96_s1 }
   0x8   :  { %v53_v14 = vsub.f32 %v90_v11, %v39_v10 }
   0x9   :  { %p103_p3 = por %p102_p2, %p101_p1 }
   0xb   :  { %p104_p4 = pnand %p103_p3, %p97_p0 }
  0x81   :  { %v57_v12 = vpop.permute.xlu0 %56 }
  0x82   :  { %v64_v13 = vmul.f32 %v57_v12, %v52_v9 }
  0x84   :  { %v66_v15 = vadd.f32 %v64_v13, %v24_v4 }
  0x85   :  { %v62_v16 = vpop.permute.xlu0 %61 }
  0x86   :  { %69 = vst.msk [vmem:[#allocation2] sm:$0xff] %vm68_vm0, %v66_v15  ;;  %v65_v17 = vmul.f32 %v62_v16, %v53_v14 }
  0x88   :  { %v67_v18 = vadd.f32 %v65_v17, %v25_v8 }
  0x8a   :  { %70 = vst.msk [vmem:[#allocation2 + $0x8] sm:$0xff] %vm68_vm0, %v67_v18 }
  0x8b   :  { %107 = shalt.err (!%p104_p4)
}
  0x8c   :  { %s108_s6 = scalar_lea.hbm %s189_s4, 256 }
  0x8d   :  { %p109_p5 = scmp.ne.s32.totalorder %s189_s4, %s108_s6  ;;  %p112_p6 = scmp.lt.u32.totalorder %s108_s6, %s189_s4 }
  0x8f   :  { %p114_p7 = pnand %p112_p6, %p109_p5 }
  0x91   :  { %117 = shalt.err (!%p114_p7)
}
  0x92   :  { %s122_s11 = smov 128   ;;  %s123_s12 = smov 8  }
  0x93   :  { %82 = dma.vmem_to_hbm [thread:$0]  %s77_s5, 256, %s189_s4, [#allocation3], %s122_s11, %s122_s11, %s123_s12  }
  0x94   :  { %118 = dma.done.wait [#allocation3], 256  }
  0x95   :  { %119 = vsyncadd [#allocation3], 4294967040 }
  0x96   :  { %86 = vsyncpa [#allocation3], 1 }

</bundles_post_ra>
